<compile_context>
chip_gen: v7x
topology: tpu7x:2x2x1
jax: 0.10.0
libtpu: 0.0.40
codegen_flags: <defaults>
</compile_context>

<pallas_src>
import jax
import jax.numpy as jnp
from jax.experimental import pallas as pl
from jax.experimental.pallas import tpu as pltpu


def _swish(x):
    # TODO(synk): spec uses nn.Swish (not a real torch module); implemented as
    # SiLU: x * sigmoid(x). exp and the approx reciprocal both go to the EUP
    # slot, off the VALU critical path. Math kept in f32 (overflow-safe:
    # exp(-x) -> inf  =>  reciprocal -> 0  =>  result -> 0, the correct limit).
    return x * pl.reciprocal(1.0 + jnp.exp(-x), approx=True)


def mean_reversion_kernel(x_ref, w1_ref, b1_ref, g_ref, be_ref,
                          w2_ref, b2_ref, w3_ref, b3_ref, out_ref):
    # Linear(state_dim, 128) + Swish  (bf16 MXU, f32 accumulate)
    x = x_ref[...].astype(jnp.bfloat16)
    h1 = jnp.dot(x, w1_ref[...], preferred_element_type=jnp.float32) + b1_ref[...]
    h1 = _swish(h1)

    # LayerNorm(128): biased variance, eps=1e-5, affine (PyTorch semantics), f32
    mu = jnp.mean(h1, axis=-1, keepdims=True)
    var = jnp.mean((h1 - mu) ** 2, axis=-1, keepdims=True)
    ln = (h1 - mu) * jax.lax.rsqrt(var + 1e-5) * g_ref[...] + be_ref[...]

    # Linear(128, 64) + Swish
    h2 = jnp.dot(ln.astype(jnp.bfloat16), w2_ref[...],
                 preferred_element_type=jnp.float32) + b2_ref[...]
    h2 = _swish(h2)

    # Linear(64, action_dim) + Tanh, scaled by -0.8 (unpadded, masked store:
    # at action_dim=8 the traffic win beats the fixed masked-vst penalty)
    out = jnp.dot(h2.astype(jnp.bfloat16), w3_ref[...],
                  preferred_element_type=jnp.float32) + b3_ref[...]
    out_ref[...] = -0.8 * jnp.tanh(out)


def _round_up(x, m):
    return (x + m - 1) // m * m


def mean_reversion_forward(state, params, *, block_b=1024):
    """Returns -strategy_net(state) * 0.8, matching the PyTorch module (eval mode)."""
    B, S = state.shape
    H1 = params["w1"].shape[1]   # 128
    H2 = params["w2"].shape[1]   # 64
    A = params["w3"].shape[1]    # action_dim

    # Batch tile: sublane-aligned; capped at ceil(B/2) (rounded up to 8) so the
    # "parallel" axis has >= 2 grid steps whenever B > 8 (v7x megacore sharding).
    # No host-side batch padding: Pallas handles the ragged last block.
    half = _round_up(pl.cdiv(B, 2), 8)
    bb = max(8, min(block_b, half))
    grid = (pl.cdiv(B, bb),)

    def full(shape):
        return pl.BlockSpec(shape, lambda i: (0,) * len(shape))

    out = pl.pallas_call(
        mean_reversion_kernel,
        grid=grid,
        in_specs=[
            pl.BlockSpec((bb, S), lambda i: (i, 0)),    # state tile
            full((S, H1)), full((1, H1)),               # W1 (bf16), b1
            full((1, H1)), full((1, H1)),               # gamma, beta
            full((H1, H2)), full((1, H2)),              # W2 (bf16), b2
            full((H2, A)), full((1, A)),                # W3 (bf16), b3
        ],
        out_specs=pl.BlockSpec((bb, A), lambda i: (i, 0)),
        out_shape=jax.ShapeDtypeStruct((B, A), jnp.float32),
        compiler_params=pltpu.CompilerParams(
            dimension_semantics=("parallel",)),
    )(state, params["w1"], params["b1"], params["gamma"], params["beta"],
      params["w2"], params["b2"], params["w3"], params["b3"])

    return out


def init_params(key, state_dim, action_dim):
    def linear(k, fan_in, fan_out):
        kw, kb = jax.random.split(k)
        bound = 1.0 / float(fan_in) ** 0.5
        w = jax.random.uniform(kw, (fan_in, fan_out), jnp.float32, -bound, bound)
        b = jax.random.uniform(kb, (1, fan_out), jnp.float32, -bound, bound)
        return w.astype(jnp.bfloat16), b   # weights bf16 (MXU-native), biases f32

    k1, k2, k3 = jax.random.split(key, 3)
    w1, b1 = linear(k1, state_dim, 128)
    w2, b2 = linear(k2, 128, 64)
    w3, b3 = linear(k3, 64, action_dim)
    return {
        "w1": w1, "b1": b1,
        "gamma": jnp.ones((1, 128), jnp.float32),
        "beta": jnp.zeros((1, 128), jnp.float32),
        "w2": w2, "b2": b2,
        "w3": w3, "b3": b3,
    }


def _reference(x, p):
    # pure-JAX reference (eval mode) mirroring the kernel's dtype policy:
    # bf16 matmul operands, f32 accumulation, f32 elementwise chain.
    bf = jnp.bfloat16

    def swish(v):
        return v * jax.nn.sigmoid(v)

    h1 = swish(jnp.dot(x.astype(bf), p["w1"],
                       preferred_element_type=jnp.float32) + p["b1"])
    mu = jnp.mean(h1, axis=-1, keepdims=True)
    var = jnp.mean((h1 - mu) ** 2, axis=-1, keepdims=True)
    ln = (h1 - mu) / jnp.sqrt(var + 1e-5) * p["gamma"] + p["beta"]
    h2 = swish(jnp.dot(ln.astype(bf), p["w2"],
                       preferred_element_type=jnp.float32) + p["b2"])
    out = jnp.dot(h2.astype(bf), p["w3"],
                  preferred_element_type=jnp.float32) + p["b3"]
    return -0.8 * jnp.tanh(out)


if __name__ == "__main__":
    key = jax.random.PRNGKey(0)
    k_param, k_x = jax.random.split(key)
    # B=13 deliberately exercises the ragged last batch block (grid of 2).
    B, S, A = 13, 32, 8
    params = init_params(k_param, S, A)
    x = jax.random.normal(k_x, (B, S), jnp.float32)

    y = mean_reversion_forward(x, params)
    jax.block_until_ready(y)

    ref = _reference(x, params)
    assert y.shape == (B, A)
    # tanh-bounded outputs in [-0.8, 0.8]; tolerance covers the approx-EUP
    # reciprocal in swish (matmul dtype policy is identical to the reference)
    assert jnp.allclose(y, ref, atol=1e-2), "mismatch vs pure-JAX reference"
    print("KERNEL_OK")
</pallas_src>

<mosaic_0001>
module attributes {stable_mosaic.version = 11 : i64} {
  func.func @mean_reversion_kernel(%arg0: i32, %arg1: memref<8x32xf32, #tpu.memory_space<vmem>>, %arg2: memref<32x128xbf16, #tpu.memory_space<vmem>>, %arg3: memref<1x128xf32, #tpu.memory_space<vmem>>, %arg4: memref<1x128xf32, #tpu.memory_space<vmem>>, %arg5: memref<1x128xf32, #tpu.memory_space<vmem>>, %arg6: memref<128x64xbf16, #tpu.memory_space<vmem>>, %arg7: memref<1x64xf32, #tpu.memory_space<vmem>>, %arg8: memref<64x8xbf16, #tpu.memory_space<vmem>>, %arg9: memref<1x8xf32, #tpu.memory_space<vmem>>, %arg10: memref<8x8xf32, #tpu.memory_space<vmem>>) attributes {dimension_semantics = [#tpu.dimension_semantics<parallel>], iteration_bounds = array<i64: 2>, scalar_prefetch = 0 : i64, scratch_operands = 0 : i64, tpu.core_type = #tpu.core_type<tc>, window_params = [{transform_indices = @transform_0, window_bounds = array<i64: 8, 32>}, {pipeline_mode = #tpu.pipeline_mode<synchronous>, transform_indices = @transform_1, window_bounds = array<i64: 32, 128>}, {pipeline_mode = #tpu.pipeline_mode<synchronous>, transform_indices = @transform_2, window_bounds = array<i64: 1, 128>}, {pipeline_mode = #tpu.pipeline_mode<synchronous>, transform_indices = @transform_3, window_bounds = array<i64: 1, 128>}, {pipeline_mode = #tpu.pipeline_mode<synchronous>, transform_indices = @transform_4, window_bounds = array<i64: 1, 128>}, {pipeline_mode = #tpu.pipeline_mode<synchronous>, transform_indices = @transform_5, window_bounds = array<i64: 128, 64>}, {pipeline_mode = #tpu.pipeline_mode<synchronous>, transform_indices = @transform_6, window_bounds = array<i64: 1, 64>}, {pipeline_mode = #tpu.pipeline_mode<synchronous>, transform_indices = @transform_7, window_bounds = array<i64: 64, 8>}, {pipeline_mode = #tpu.pipeline_mode<synchronous>, transform_indices = @transform_8, window_bounds = array<i64: 1, 8>}, {transform_indices = @transform_9, window_bounds = array<i64: 8, 8>}]} {
    %c0 = arith.constant 0 : index
    %c0_0 = arith.constant 0 : index
    %0 = vector.load %arg1[%c0, %c0_0] : memref<8x32xf32, #tpu.memory_space<vmem>>, vector<8x32xf32>
    %1 = arith.truncf %0 : vector<8x32xf32> to vector<8x32xbf16>
    %c0_1 = arith.constant 0 : index
    %c0_2 = arith.constant 0 : index
    %2 = vector.load %arg2[%c0_1, %c0_2] : memref<32x128xbf16, #tpu.memory_space<vmem>>, vector<32x128xbf16>
    %cst = arith.constant dense<0.000000e+00> : vector<8x128xf32>
    %3 = tpu.matmul %1, %2, %cst {dimension_numbers = #tpu.dot_dimension_numbers<[1], [0], [0], [1], [0, 0, 1, 1], [], []>} : vector<8x32xbf16>, vector<32x128xbf16>, vector<8x128xf32> -> vector<8x128xf32>
    %c0_3 = arith.constant 0 : index
    %c0_4 = arith.constant 0 : index
    %4 = vector.load %arg3[%c0_3, %c0_4] : memref<1x128xf32, #tpu.memory_space<vmem>>, vector<1x128xf32>
    %5 = vector.broadcast %4 : vector<1x128xf32> to vector<8x128xf32>
    %6 = arith.addf %3, %5 : vector<8x128xf32>
    %cst_5 = arith.constant 0.000000e+00 : f32
    %7 = vector.broadcast %cst_5 : f32 to vector<8x128xf32>
    %8 = arith.subf %7, %6 : vector<8x128xf32>
    %9 = math.exp %8 : vector<8x128xf32>
    %cst_6 = arith.constant 1.000000e+00 : f32
    %10 = vector.broadcast %cst_6 : f32 to vector<8x128xf32>
    %11 = arith.addf %10, %9 : vector<8x128xf32>
    %12 = tpu.reciprocal %11 {approx = true} : vector<8x128xf32> -> vector<8x128xf32>
    %13 = arith.mulf %6, %12 : vector<8x128xf32>
    %cst_7 = arith.constant dense<0.000000e+00> : vector<8xf32>
    %14 = vector.multi_reduction <add>, %13, %cst_7 [1] : vector<8x128xf32> to vector<8xf32>
    %15 = vector.shape_cast %14 : vector<8xf32> to vector<8x1xf32>
    %cst_8 = arith.constant 1.280000e+02 : f32
    %16 = vector.broadcast %cst_8 : f32 to vector<8x1xf32>
    %17 = arith.divf %15, %16 : vector<8x1xf32>
    %18 = vector.broadcast %17 : vector<8x1xf32> to vector<8x128xf32>
    %19 = arith.subf %13, %18 : vector<8x128xf32>
    %20 = arith.mulf %19, %19 : vector<8x128xf32>
    %cst_9 = arith.constant dense<0.000000e+00> : vector<8xf32>
    %21 = vector.multi_reduction <add>, %20, %cst_9 [1] : vector<8x128xf32> to vector<8xf32>
    %22 = vector.shape_cast %21 : vector<8xf32> to vector<8x1xf32>
    %cst_10 = arith.constant 1.280000e+02 : f32
    %23 = vector.broadcast %cst_10 : f32 to vector<8x1xf32>
    %24 = arith.divf %22, %23 : vector<8x1xf32>
    %25 = vector.broadcast %17 : vector<8x1xf32> to vector<8x128xf32>
    %26 = arith.subf %13, %25 : vector<8x128xf32>
    %cst_11 = arith.constant 9.99999974E-6 : f32
    %27 = vector.broadcast %cst_11 : f32 to vector<8x1xf32>
    %28 = arith.addf %24, %27 : vector<8x1xf32>
    %29 = math.rsqrt %28 : vector<8x1xf32>
    %30 = vector.broadcast %29 : vector<8x1xf32> to vector<8x128xf32>
    %31 = arith.mulf %26, %30 : vector<8x128xf32>
    %c0_12 = arith.constant 0 : index
    %c0_13 = arith.constant 0 : index
    %32 = vector.load %arg4[%c0_12, %c0_13] : memref<1x128xf32, #tpu.memory_space<vmem>>, vector<1x128xf32>
    %33 = vector.broadcast %32 : vector<1x128xf32> to vector<8x128xf32>
    %34 = arith.mulf %31, %33 : vector<8x128xf32>
    %c0_14 = arith.constant 0 : index
    %c0_15 = arith.constant 0 : index
    %35 = vector.load %arg5[%c0_14, %c0_15] : memref<1x128xf32, #tpu.memory_space<vmem>>, vector<1x128xf32>
    %36 = vector.broadcast %35 : vector<1x128xf32> to vector<8x128xf32>
    %37 = arith.addf %34, %36 : vector<8x128xf32>
    %38 = arith.truncf %37 : vector<8x128xf32> to vector<8x128xbf16>
    %c0_16 = arith.constant 0 : index
    %c0_17 = arith.constant 0 : index
    %39 = vector.load %arg6[%c0_16, %c0_17] : memref<128x64xbf16, #tpu.memory_space<vmem>>, vector<128x64xbf16>
    %cst_18 = arith.constant dense<0.000000e+00> : vector<8x64xf32>
    %40 = tpu.matmul %38, %39, %cst_18 {dimension_numbers = #tpu.dot_dimension_numbers<[1], [0], [0], [1], [0, 0, 1, 1], [], []>} : vector<8x128xbf16>, vector<128x64xbf16>, vector<8x64xf32> -> vector<8x64xf32>
    %c0_19 = arith.constant 0 : index
    %c0_20 = arith.constant 0 : index
    %41 = vector.load %arg7[%c0_19, %c0_20] : memref<1x64xf32, #tpu.memory_space<vmem>>, vector<1x64xf32>
    %42 = vector.broadcast %41 : vector<1x64xf32> to vector<8x64xf32>
    %43 = arith.addf %40, %42 : vector<8x64xf32>
    %cst_21 = arith.constant 0.000000e+00 : f32
    %44 = vector.broadcast %cst_21 : f32 to vector<8x64xf32>
    %45 = arith.subf %44, %43 : vector<8x64xf32>
    %46 = math.exp %45 : vector<8x64xf32>
    %cst_22 = arith.constant 1.000000e+00 : f32
    %47 = vector.broadcast %cst_22 : f32 to vector<8x64xf32>
    %48 = arith.addf %47, %46 : vector<8x64xf32>
    %49 = tpu.reciprocal %48 {approx = true} : vector<8x64xf32> -> vector<8x64xf32>
    %50 = arith.mulf %43, %49 : vector<8x64xf32>
    %51 = arith.truncf %50 : vector<8x64xf32> to vector<8x64xbf16>
    %c0_23 = arith.constant 0 : index
    %c0_24 = arith.constant 0 : index
    %52 = vector.load %arg8[%c0_23, %c0_24] : memref<64x8xbf16, #tpu.memory_space<vmem>>, vector<64x8xbf16>
    %cst_25 = arith.constant dense<0.000000e+00> : vector<8x8xf32>
    %53 = tpu.matmul %51, %52, %cst_25 {dimension_numbers = #tpu.dot_dimension_numbers<[1], [0], [0], [1], [0, 0, 1, 1], [], []>} : vector<8x64xbf16>, vector<64x8xbf16>, vector<8x8xf32> -> vector<8x8xf32>
    %c0_26 = arith.constant 0 : index
    %c0_27 = arith.constant 0 : index
    %54 = vector.load %arg9[%c0_26, %c0_27] : memref<1x8xf32, #tpu.memory_space<vmem>>, vector<1x8xf32>
    %55 = vector.broadcast %54 : vector<1x8xf32> to vector<8x8xf32>
    %56 = arith.addf %53, %55 : vector<8x8xf32>
    %57 = math.tanh %56 : vector<8x8xf32>
    %cst_28 = arith.constant -8.000000e-01 : f32
    %58 = vector.broadcast %cst_28 : f32 to vector<8x8xf32>
    %59 = arith.mulf %58, %57 : vector<8x8xf32>
    %c0_29 = arith.constant 0 : index
    %c0_30 = arith.constant 0 : index
    %60 = vector.load %arg10[%c0_29, %c0_30] : memref<8x8xf32, #tpu.memory_space<vmem>>, vector<8x8xf32>
    tpu.vector_store %arg10[%c0_29, %c0_30], %59 {strides = array<i32>} : memref<8x8xf32, #tpu.memory_space<vmem>>, vector<8x8xf32>,
    return
  }
  func.func @transform_0(%arg0: i32) -> (i32, i32) {
    %c0_i32 = arith.constant 0 : i32
    %c0_i32_0 = arith.constant 0 : i32
    return %arg0, %c0_i32 : i32, i32
  }
  func.func @transform_1(%arg0: i32) -> (i32, i32) {
    %c0_i32 = arith.constant 0 : i32
    %c0_i32_0 = arith.constant 0 : i32
    %c0_i32_1 = arith.constant 0 : i32
    return %c0_i32, %c0_i32_0 : i32, i32
  }
  func.func @transform_2(%arg0: i32) -> (i32, i32) {
    %c0_i32 = arith.constant 0 : i32
    %c0_i32_0 = arith.constant 0 : i32
    %c0_i32_1 = arith.constant 0 : i32
    return %c0_i32, %c0_i32_0 : i32, i32
  }
  func.func @transform_3(%arg0: i32) -> (i32, i32) {
    %c0_i32 = arith.constant 0 : i32
    %c0_i32_0 = arith.constant 0 : i32
    %c0_i32_1 = arith.constant 0 : i32
    return %c0_i32, %c0_i32_0 : i32, i32
  }
  func.func @transform_4(%arg0: i32) -> (i32, i32) {
    %c0_i32 = arith.constant 0 : i32
    %c0_i32_0 = arith.constant 0 : i32
    %c0_i32_1 = arith.constant 0 : i32
    return %c0_i32, %c0_i32_0 : i32, i32
  }
  func.func @transform_5(%arg0: i32) -> (i32, i32) {
    %c0_i32 = arith.constant 0 : i32
    %c0_i32_0 = arith.constant 0 : i32
    %c0_i32_1 = arith.constant 0 : i32
    return %c0_i32, %c0_i32_0 : i32, i32
  }
  func.func @transform_6(%arg0: i32) -> (i32, i32) {
    %c0_i32 = arith.constant 0 : i32
    %c0_i32_0 = arith.constant 0 : i32
    %c0_i32_1 = arith.constant 0 : i32
    return %c0_i32, %c0_i32_0 : i32, i32
  }
  func.func @transform_7(%arg0: i32) -> (i32, i32) {
    %c0_i32 = arith.constant 0 : i32
    %c0_i32_0 = arith.constant 0 : i32
    %c0_i32_1 = arith.constant 0 : i32
    return %c0_i32, %c0_i32_0 : i32, i32
  }
  func.func @transform_8(%arg0: i32) -> (i32, i32) {
    %c0_i32 = arith.constant 0 : i32
    %c0_i32_0 = arith.constant 0 : i32
    %c0_i32_1 = arith.constant 0 : i32
    return %c0_i32, %c0_i32_0 : i32, i32
  }
  func.func @transform_9(%arg0: i32) -> (i32, i32) {
    %c0_i32 = arith.constant 0 : i32
    %c0_i32_0 = arith.constant 0 : i32
    return %arg0, %c0_i32 : i32, i32
  }
}

</mosaic_0001>

<bundles_post_ra>
// kernel: tpu_custom_call.1
= control target key start
LH: loop header
LB: loop body
LE: loop exit
PB: predicated region body
PF: predicated region fallthrough
CT: control target
= control target key end

     0   :  { %s874_s30 = smov 0   ;;  %s972_s0 = inlined_call_operand.vmem [shape: f32[13,32], index: 0, kind: input, shape index: {}]   ;;  %s973_s1 = inlined_call_operand.vmem [shape: bf16[32,128], index: 1, kind: input, shape index: {}]   ;;  %s974_s2 = inlined_call_operand.vmem [shape: f32[1,128], index: 2, kind: input, shape index: {}]   ;;  %s975_s3 = inlined_call_operand.vmem [shape: f32[1,128], index: 3, kind: input, shape index: {}]   ;;  %s976_s4 = inlined_call_operand.vmem [shape: f32[1,128], index: 4, kind: input, shape index: {}]   ;;  %s977_s5 = inlined_call_operand.vmem [shape: bf16[128,64], index: 5, kind: input, shape index: {}]   ;;  %s978_s6 = inlined_call_operand.vmem [shape: f32[1,64], index: 6, kind: input, shape index: {}]   ;;  %s979_s7 = inlined_call_operand.vmem [shape: bf16[64,8], index: 7, kind: input, shape index: {}]   ;;  %s980_s8 = inlined_call_operand.vmem [shape: f32[1,8], index: 8, kind: input, shape index: {}]   ;;  %s981_s9 = inlined_call_operand.vmem [shape: f32[13,8], index: 9, kind: output, shape index: {}]  }
   0x1 LB: > { %s691_s10 = sadd.s32 4294967295, %s820_s30   ;;  %p695_p0 = scmp.ge.s32.totalorder %s820_s30, 1  ;;  %s820_s30 = sphi %s874_s30, %s19_s30  }
   0x2   : > { %p286_p1 = scmp.lt.s32.totalorder %s820_s30, 3 }
   0x4   : > { %p287_p2 = pnand %p695_p0, %p286_p1 }
   0x5   : > { %v788_v0 = vld [vmem:[%s973_s1] sm:$0xff] (!%p287_p2)   ;;  %v822_v1 = vmov (!%p287_p2), 0.0   ;;  %v789_v2 = vld [vmem:[%s973_s1 + $0x8] sm:$0xff] (!%p287_p2)   ;;  %vm823_vm0 = vmmov (!%p287_p2), 0   ;;  %p320_p3 = scmp.lt.s32.totalorder (!%p287_p2), %s691_s10, 1  ;;  %vm354_vm1 = vcmask (!%p287_p2), 261120  }
   0x6   : > { %290 = sbr.rel (%p287_p2) target bundleno = 1050 (0x41a), region = 56  ;;  %738 = vmatprep.subr.bf16.mxu0 (!%p287_p2), %v822_v1  ;;  %746 = vmatprep.subr.bf16.mxu1 (!%p287_p2), %v822_v1  ;;  %v698_v5 = vld [vmem:[%s974_s2] ss:$0 sm:$0xff] (!%p287_p2)  ;;  %v791_v18 = vld [vmem:[%s977_s5 + $0x8] sm:$0xff] (!%p287_p2)   ;;  %v792_v23 = vld [vmem:[%s977_s5 + $0x10] sm:$0xff] (!%p287_p2)   ;;  %vm590_vm2 = vcmask (!%p287_p2), 523264  }
   0x7   : > { %739 = vmatpush3.bf16.msra.mxu0 (!%p287_p2), %v788_v0  ;;  %742 = vmatprep.mubr.msk.bf16.mxu0 (!%p287_p2), %vm823_vm0, %v822_v1  ;;  %v790_v17 = vld [vmem:[%s977_s5] sm:$0xff] (!%p287_p2)   ;;  %v793_v24 = vld [vmem:[%s977_s5 + $0x18] sm:$0xff] (!%p287_p2)   ;;  %v795_v26 = vld [vmem:[%s977_s5 + $0x28] sm:$0xff] (!%p287_p2)   ;;  %vm636_vm3 = vcmask (!%p287_p2), 64512  }
   0x8   : > { %740 = vmatprep.subr.bf16.mxu0 (!%p287_p2), %v822_v1  ;;  %762 = vmatprep.mubr.msk.bf16.mxu1 (!%p287_p2), %vm823_vm0, %v822_v1  ;;  %v794_v25 = vld [vmem:[%s977_s5 + $0x20] sm:$0xff] (!%p287_p2)   ;;  %v796_v27 = vld [vmem:[%s977_s5 + $0x30] sm:$0xff] (!%p287_p2)   ;;  %v797_v28 = vld [vmem:[%s977_s5 + $0x38] sm:$0xff] (!%p287_p2)  }
   0x9   : > { %747 = vmatpush3.bf16.msra.mxu1 (!%p287_p2), %v790_v17  ;;  %v702_v33 = vld [vmem:[%s975_s3] ss:$0 sm:$0xff] (!%p287_p2)  ;;  %v799_v40 = vld [vmem:[%s979_s7 + $0x8] sm:$0xff] (!%p287_p2)   ;;  %v800_v41 = vld [vmem:[%s979_s7 + $0x10] sm:$0xff] (!%p287_p2)  }
   0xa   : > { %748 = vmatprep.subr.bf16.mxu1 (!%p287_p2), %v822_v1  ;;  %v703_v35 = vld [vmem:[%s976_s4] ss:$0 sm:$0xff] (!%p287_p2)  ;;  %v801_v42 = vld [vmem:[%s979_s7 + $0x18] sm:$0xff] (!%p287_p2)  }
   0xb   : > { %741 = vmatpush3.bf16.msra.mxu0 (!%p287_p2), %v789_v2  ;;  %v798_v39 = vld [vmem:[%s979_s7] sm:$0xff] (!%p287_p2)  }
   0xc   : > { %766 = vmatprep.subr.bf16.mxu0 (!%p287_p2), %v822_v1  ;;  %v704_v43 = vld [vmem:[%s978_s6] ss:$0 sm:$0xff] (!%p287_p2) }
   0xd   : > { %s983_s10 = smov (!%p320_p3, %s691_s10), 1  ;;  %749 = vmatpush3.bf16.msra.mxu1 %v791_v18  ;;  %v713_v56 = vld [vmem:[%s980_s8] ss:$0 sm:$0xff] }
   0xe   : > { %s696_s15 = sshll.u32 %s983_s10, 3  ;;  %750 = vmatprep.subr.bf16.mxu1 %v822_v1 }
   0xf   : > { %s323_s18 = scalar_lea.vmem %s972_s0, %s696_s15  ;;  %s327_s19 = scalar_lea.vmem %s981_s9, %s696_s15 }
  0x10   : > { %v329_v3 = vld [vmem:[%s323_s18] sm:$0xff] }
  0x11   : > { %v330_v4 = vpack.c.bf16 %v329_v3, %v329_v3  ;;  %751 = vmatpush3.bf16.msra.mxu1 %v792_v23 }
  0x12   : > { %752 = vmatprep.subr.bf16.mxu1 %v822_v1 }
  0x13   : > { %743 = vmatmul.mubr.msk.bf16.vlgmr.msra.gmra.mrb[0].mxu0 %vm354_vm1, %v330_v4 }
  0x14   : > { %774 = vmatprep.mubr.msk.bf16.mxu0 %vm823_vm0, %v822_v1  ;;  %767 = vmatpush3.bf16.msra.mxu0 %v798_v39 }
  0x15   : > { %753 = vmatpush3.bf16.msra.mxu1 %v793_v24  ;;  %768 = vmatprep.subr.bf16.mxu0 %v822_v1 }
  0x16   : > { %754 = vmatprep.subr.bf16.mxu1 %v822_v1 }
  0x18   : > { %769 = vmatpush3.bf16.msra.mxu0 %v799_v40 }
  0x19   : > { %755 = vmatpush3.bf16.msra.mxu1 %v794_v25  ;;  %770 = vmatprep.subr.bf16.mxu0 %v822_v1 }
  0x1a   : > { %756 = vmatprep.subr.bf16.mxu1 %v822_v1 }
  0x1c   : > { %771 = vmatpush3.bf16.msra.mxu0 %v800_v41 }
  0x1d   : > { %757 = vmatpush3.bf16.msra.mxu1 %v795_v26  ;;  %772 = vmatprep.subr.bf16.mxu0 %v822_v1 }
  0x1e   : > { %758 = vmatprep.subr.bf16.mxu1 %v822_v1 }
  0x20   : > { %773 = vmatpush3.bf16.msra.mxu0 %v801_v42 }
  0x21   : > { %759 = vmatpush3.bf16.msra.mxu1 %v796_v27 }
  0x22   : > { %760 = vmatprep.subr.bf16.mxu1 %v822_v1 }
  0x25   : > { %761 = vmatpush3.bf16.msra.mxu1 %v797_v28 }
  0xe6   : > { %v392_v6 = vpop.f32.mrb[0].mxu0 }
  0xe7   : > { %v393_v7 = vadd.f32 %v698_v5, %v392_v6  ;;  %v744_v8 = vpop.f32.mrb[1].mxu0 }
  0xe8   : > { %v395_v9 = vpop.f32.mrb[2].mxu0 }
  0xe9   : > { %v398_v10 = vsub.f32 0.0, %v393_v7  ;;  %v745_v11 = vpop.f32.mrb[3].mxu0 }
  0xeb   : > { %v399_v12 = vmul.f32 1.442695, %v398_v10 }
  0xed   : > { %802 = vpow2.f32 %v399_v12 }
  0xf7   : > { %v803_v13 = vpop.eup %802 }
  0xf8   : > { %v401_v14 = vadd.f32 1.0, %v803_v13 }
  0xfa   : > { %804 = vrcp.f32 %v401_v14 }
 0x104   : > { %v805_v15 = vpop.eup %804 }
 0x105   : > { %v403_v16 = vmul.f32 %v805_v15, %v393_v7 }
 0x107   : > { %404 = vadd.xlane.f32.xlu0 %v403_v16 }
 0x194   : > { %v405_v19 = vpop.xlane.xlu0 %404 }
 0x195   : > { %v407_v20 = vmul.f32 0.0078125, %v405_v19 }
 0x197   : > { %v408_v21 = vsub.f32 %v403_v16, %v407_v20 }
 0x199   : > { %v409_v22 = vmul.f32 %v408_v21, %v408_v21 }
 0x19b   : > { %410 = vadd.xlane.f32.xlu0 %v409_v22 }
 0x228   : > { %v411_v29 = vpop.xlane.xlu0 %410 }
 0x229   : > { %v412_v30 = vmul.f32 0.0078125, %v411_v29 }
 0x22b   : > { %v413_v31 = vadd.f32 1e-05, %v412_v30 }
 0x22d   : > { %806 = vrsqrt.f32 %v413_v31 }
 0x237   : > { %v807_v32 = vpop.eup %806 }
 0x238   : > { %v415_v34 = vmul.f32 %v807_v32, %v408_v21 }
 0x23a   : > { %v423_v36 = vmul.f32 %v702_v33, %v415_v34 }
 0x23c   : > { %v431_v37 = vadd.f32 %v703_v35, %v423_v36 }
 0x23e   : > { %v432_v38 = vpack.c.bf16 %v431_v37, %v431_v37 }
 0x240   : > { %763 = vmatmul.mubr.bf16.vlgmr.msra.gmra.mrb[0].mxu1 %v432_v38 }
 0x313   : > { %v538_v44 = vpop.f32.mrb[0].mxu1 }
 0x314   : > { %v539_v45 = vadd.f32 %v704_v43, %v538_v44  ;;  %v764_v46 = vpop.f32.mrb[1].mxu1 }
 0x315   : > { %v541_v47 = vpop.f32.mrb[2].mxu1 }
 0x316   : > { %v544_v48 = vsub.f32 0.0, %v539_v45  ;;  %v765_v49 = vpop.f32.mrb[3].mxu1 }
 0x318   : > { %v545_v50 = vmul.f32 1.442695, %v544_v48 }
 0x31a   : > { %808 = vpow2.f32 %v545_v50 }
 0x324   : > { %v809_v51 = vpop.eup %808 }
 0x325   : > { %v547_v52 = vadd.f32 1.0, %v809_v51 }
 0x327   : > { %810 = vrcp.f32 %v547_v52 }
 0x331   : > { %v811_v53 = vpop.eup %810 }
 0x332   : > { %v549_v54 = vmul.f32 %v811_v53, %v539_v45 }
 0x334   : > { %v550_v55 = vpack.c.bf16 %v549_v54, %v549_v54 }
 0x336   : > { %775 = vmatmul.mubr.msk.bf16.vlgmr.msra.gmra.mrb[4].mxu0 %vm590_vm2, %v550_v55 }
 0x409   : > { %v628_v57 = vpop.f32.mrb[4].mxu0 }
 0x40a   : > { %v629_v58 = vadd.f32 %v713_v56, %v628_v57  ;;  %v776_v59 = vpop.f32.mrb[5].mxu0 }
 0x40b   : > { %v631_v60 = vpop.f32.mrb[6].mxu0 }
 0x40c   : > { %812 = vtanh.f32 %v629_v58  ;;  %v777_v61 = vpop.f32.mrb[7].mxu0 }
 0x416   : > { %v813_v62 = vpop.eup %812 }
 0x417   : > { %v635_v63 = vmul.f32 -0.8, %v813_v62 }
 0x419   : > { %637 = vst.msk [vmem:[%s327_s19] sm:$0xff] %vm636_vm3, %v635_v63 }
 0x41a PF: > { %s19_s30 = sadd.s32 1, %s820_s30  }
 0x41b   : > { %p16_p4 = scmp.ge.s32.totalorder %s19_s30, 4  }
 0x41d   :  { %18 = sbr.rel (!%p16_p4) target bundleno = 1 (0x1), region = 86 }

</bundles_post_ra>
